<compile_context>
chip_gen: v5e
topology: v5e:2x2
jax: 0.10.0
libtpu: 0.0.40
codegen_flags: <defaults>
</compile_context>

<pallas_src>
import functools

import jax
import jax.numpy as jnp
from jax.experimental import pallas as pl
from jax.experimental.pallas import tpu as pltpu


# ---------------------------------------------------------------------------
# Model configuration (deterministic, in-script)
# ---------------------------------------------------------------------------
SEQ_LEN = 16
EMB_DIM = 8
HIDDEN = [32, 24]

ENC_DIMS = [SEQ_LEN] + HIDDEN + [EMB_DIM]          # [16, 32, 24, 8]
DEC_DIMS = [EMB_DIM] + HIDDEN[::-1] + [SEQ_LEN]    # [8, 24, 32, 16]


def _round_up(x, m):
    return (x + m - 1) // m * m


# Fused layer shapes: encoder layers 0..2, then fused (mean||var) decoder layers 3..5.
_IN_DIMS = (ENC_DIMS[0], ENC_DIMS[1], ENC_DIMS[2],
            DEC_DIMS[0], 2 * DEC_DIMS[1], 2 * DEC_DIMS[2])       # (16, 32, 24, 8, 48, 64)
_OUT_DIMS = (ENC_DIMS[1], ENC_DIMS[2], ENC_DIMS[3],
             2 * DEC_DIMS[1], 2 * DEC_DIMS[2], 2 * DEC_DIMS[3])  # (32, 24, 8, 48, 64, 32)

# Sublane offset of each layer's (out, in) weight block (and its (out, 1) bias block)
# inside the packed slabs.  Offsets rounded to multiples of 8 -> aligned static slices.
_ROW_OFF = []
_off = 0
for _d in _OUT_DIMS:
    _ROW_OFF.append(_off)
    _off = _round_up(_off + _d, 8)
_ROW_OFF = tuple(_ROW_OFF)                         # (0, 32, 56, 64, 112, 176)
SLAB_ROWS = _round_up(_off, 8)                     # 208
W_SLAB_COLS = max(_IN_DIMS)                        # 64 (full-array block, so <128 is OK)


def _sigmoid(y):
    # logistic via a single tanh EUP push: sigmoid(y) == 0.5 * (tanh(y / 2) + 1)
    return 0.5 * (jnp.tanh(0.5 * y) + 1.0)


# ---------------------------------------------------------------------------
# Pallas kernel: entire AutoEncoder forward, feature-major (batch on lanes).
#   x_ref   : (SEQ_LEN, TB)       input tile
#   w_ref   : (SLAB_ROWS, 64)     packed (out, in) weight blocks (resident)
#   b_ref   : (SLAB_ROWS, 1)      packed (out, 1) bias blocks    (resident)
#   out_ref : (2*SEQ_LEN, TB)     [mean | var] stacked on sublanes
# ---------------------------------------------------------------------------
def autoencoder_kernel(x_ref, w_ref, b_ref, out_ref):
    def layer(h, idx):
        r0 = _ROW_OFF[idx]
        fi = _IN_DIMS[idx]
        fo = _OUT_DIMS[idx]
        w = w_ref[r0:r0 + fo, 0:fi]          # (out, in) static slab slice
        b = b_ref[r0:r0 + fo, :]             # (out, 1), lane-broadcast against (out, TB)
        return jnp.dot(w, h, preferred_element_type=jnp.float32) + b

    # ---- Encoder: Linear->Sigmoid, Linear->Sigmoid, Linear->Tanh ----
    h = x_ref[...]                           # (16, TB) f32
    h = _sigmoid(layer(h, 0))                # (32, TB)
    h = _sigmoid(layer(h, 1))                # (24, TB)
    z = jnp.tanh(layer(h, 2))                # ( 8, TB)

    # ---- Fused decoders (mean || var): Linear->Sigmoid, Linear->Sigmoid, Linear ----
    d = _sigmoid(layer(z, 3))                # (48, TB)
    d = _sigmoid(layer(d, 4))                # (64, TB)
    out_ref[...] = layer(d, 5).astype(out_ref.dtype)   # (32, TB) = [mean | var]


# ---------------------------------------------------------------------------
# Host-side parameter packing: fuse the two decoders and build the two slabs.
# Weights arrive as (in, out); they are transposed into (out, in) blocks here.
# ---------------------------------------------------------------------------
def _pack_params(enc_params, dec_mean_params, dec_var_params):
    ew0, eb0, ew1, eb1, ew2, eb2 = enc_params
    mw0, mb0, mw1, mb1, mw2, mb2 = dec_mean_params
    vw0, vb0, vw1, vb1, vw2, vb2 = dec_var_params

    # Fused decoder: layer 0 -> [Wm0 | Wv0]; layers 1-2 -> blockdiag(Wm, Wv). Exact in f32.
    dw0 = jnp.concatenate([mw0, vw0], axis=1)                 # (8, 48)
    dw1 = jax.scipy.linalg.block_diag(mw1, vw1)               # (48, 64)
    dw2 = jax.scipy.linalg.block_diag(mw2, vw2)               # (64, 32)
    db0 = jnp.concatenate([mb0, vb0], axis=1)                 # (1, 48)
    db1 = jnp.concatenate([mb1, vb1], axis=1)                 # (1, 64)
    db2 = jnp.concatenate([mb2, vb2], axis=1)                 # (1, 32)

    weights = (ew0, ew1, ew2, dw0, dw1, dw2)
    biases = (eb0, eb1, eb2, db0, db1, db2)

    w_slab = jnp.zeros((SLAB_ROWS, W_SLAB_COLS), jnp.float32)
    b_slab = jnp.zeros((SLAB_ROWS, 1), jnp.float32)
    for off, w, b in zip(_ROW_OFF, weights, biases):
        w_slab = jax.lax.dynamic_update_slice(w_slab, w.T.astype(jnp.float32), (off, 0))
        b_slab = jax.lax.dynamic_update_slice(b_slab, b.T.astype(jnp.float32), (off, 0))
    return w_slab, b_slab


# ---------------------------------------------------------------------------
# Parameter init (mimics torch.nn.Linear default: U(-1/sqrt(in), 1/sqrt(in)))
# Weights stored as (in_dim, out_dim); biases as (1, out_dim).
# ---------------------------------------------------------------------------
def init_mlp_params(key, dims):
    params = []
    for i in range(len(dims) - 1):
        key, kw, kb = jax.random.split(key, 3)
        fan_in, fan_out = dims[i], dims[i + 1]
        bound = 1.0 / (fan_in ** 0.5)
        w = jax.random.uniform(kw, (fan_in, fan_out), jnp.float32, -bound, bound)
        b = jax.random.uniform(kb, (1, fan_out), jnp.float32, -bound, bound)
        params.extend([w, b])
    return params, key


# ---------------------------------------------------------------------------
# Wrapper
# ---------------------------------------------------------------------------
@functools.partial(jax.jit, static_argnames=("batch_tile",))
def autoencoder_forward(x, enc_params, dec_mean_params, dec_var_params, batch_tile=8192):
    """x: (B, seq_len, 1) -> dict with 'mean', 'aleatoric_var', each (B, seq_len, 1)."""
    B = x.shape[0]
    # squeeze(-1) then feature-major: (seq_len, B) with batch on lanes.
    xt = x[..., 0].astype(jnp.float32).T

    w_slab, b_slab = _pack_params(enc_params, dec_mean_params, dec_var_params)

    # Adaptive batch tile: multiple of 128 lanes, padding waste bounded by < 1 tile.
    n_tiles = max(1, -(-B // int(batch_tile)))
    tb = _round_up(-(-B // n_tiles), 128)
    bp = n_tiles * tb
    if bp != B:
        xt = jnp.pad(xt, ((0, 0), (0, bp - B)))

    out = pl.pallas_call(
        autoencoder_kernel,
        out_shape=jax.ShapeDtypeStruct((2 * SEQ_LEN, bp), jnp.float32),
        grid_spec=pltpu.PrefetchScalarGridSpec(
            num_scalar_prefetch=0,
            grid=(n_tiles,),
            in_specs=[
                pl.BlockSpec((SEQ_LEN, tb), lambda i: (0, i)),            # x tile (16, TB)
                pl.BlockSpec((SLAB_ROWS, W_SLAB_COLS), lambda i: (0, 0)), # weights (resident)
                pl.BlockSpec((SLAB_ROWS, 1), lambda i: (0, 0)),           # biases  (resident)
            ],
            out_specs=pl.BlockSpec((2 * SEQ_LEN, tb), lambda i: (0, i)),  # [mean|var] (32, TB)
        ),
        compiler_params=pltpu.CompilerParams(
            dimension_semantics=("parallel",),   # batch grid; see v7x CORE_PARALLEL TODO above
        ),
    )(xt, w_slab, b_slab)

    mean = out[:SEQ_LEN, :B].T                  # (B, seq_len)
    var = out[SEQ_LEN:, :B].T
    return {"mean": mean[..., None], "aleatoric_var": var[..., None]}


# ---------------------------------------------------------------------------
# Pure-JAX reference for sanity checking the kernel
# ---------------------------------------------------------------------------
def reference_forward(x, enc_params, dec_mean_params, dec_var_params):
    def mlp(h, params, acts):
        n = len(params) // 2
        for i in range(n):
            w, b = params[2 * i], params[2 * i + 1]
            h = h @ w + b
            if acts[i] is not None:
                h = acts[i](h)
        return h

    h = x[..., 0]
    z = mlp(h, enc_params, [jax.nn.sigmoid, jax.nn.sigmoid, jnp.tanh])
    mean = mlp(z, dec_mean_params, [jax.nn.sigmoid, jax.nn.sigmoid, None])
    var = mlp(z, dec_var_params, [jax.nn.sigmoid, jax.nn.sigmoid, None])
    return {"mean": mean[..., None], "aleatoric_var": var[..., None]}


if __name__ == "__main__":
    key = jax.random.PRNGKey(0)

    enc_params, key = init_mlp_params(key, ENC_DIMS)
    dec_mean_params, key = init_mlp_params(key, DEC_DIMS)
    dec_var_params, key = init_mlp_params(key, DEC_DIMS)

    B = 8
    key, kx = jax.random.split(key)
    x = jax.random.normal(kx, (B, SEQ_LEN, 1), jnp.float32)

    out = autoencoder_forward(x, enc_params, dec_mean_params, dec_var_params)
    jax.block_until_ready(out)

    ref = reference_forward(x, enc_params, dec_mean_params, dec_var_params)
    for k in ("mean", "aleatoric_var"):
        assert out[k].shape == (B, SEQ_LEN, 1), out[k].shape
        err = float(jnp.max(jnp.abs(out[k] - ref[k])))
        assert err < 1e-5, f"{k} max abs err {err}"

    print("KERNEL_OK")
</pallas_src>

<mosaic_0001>
module attributes {stable_mosaic.version = 11 : i64} {
  func.func @autoencoder_kernel(%arg0: i32, %arg1: memref<16x128xf32, #tpu.memory_space<vmem>>, %arg2: memref<208x64xf32, #tpu.memory_space<vmem>>, %arg3: memref<208x1xf32, #tpu.memory_space<vmem>>, %arg4: memref<32x128xf32, #tpu.memory_space<vmem>>) attributes {dimension_semantics = [#tpu.dimension_semantics<parallel>], iteration_bounds = array<i64: 1>, scalar_prefetch = 0 : i64, scratch_operands = 0 : i64, tpu.core_type = #tpu.core_type<tc>, window_params = [{transform_indices = @transform_0, window_bounds = array<i64: 16, 128>}, {pipeline_mode = #tpu.pipeline_mode<synchronous>, transform_indices = @transform_1, window_bounds = array<i64: 208, 64>}, {pipeline_mode = #tpu.pipeline_mode<synchronous>, transform_indices = @transform_2, window_bounds = array<i64: 208, 1>}, {transform_indices = @transform_3, window_bounds = array<i64: 32, 128>}]} {
    %c0 = arith.constant 0 : index
    %c0_0 = arith.constant 0 : index
    %0 = vector.load %arg1[%c0, %c0_0] : memref<16x128xf32, #tpu.memory_space<vmem>>, vector<16x128xf32>
    %c0_1 = arith.constant 0 : index
    %c0_2 = arith.constant 0 : index
    %1 = vector.load %arg2[%c0_1, %c0_2] : memref<208x64xf32, #tpu.memory_space<vmem>>, vector<32x16xf32>
    %c0_3 = arith.constant 0 : index
    %c0_4 = arith.constant 0 : index
    %2 = vector.load %arg3[%c0_3, %c0_4] : memref<208x1xf32, #tpu.memory_space<vmem>>, vector<32x1xf32>
    %cst = arith.constant dense<0.000000e+00> : vector<32x128xf32>
    %3 = tpu.matmul %1, %0, %cst {dimension_numbers = #tpu.dot_dimension_numbers<[1], [0], [0], [1], [0, 0, 1, 1], [], []>} : vector<32x16xf32>, vector<16x128xf32>, vector<32x128xf32> -> vector<32x128xf32>
    %4 = vector.broadcast %2 : vector<32x1xf32> to vector<32x128xf32>
    %5 = arith.addf %3, %4 : vector<32x128xf32>
    %cst_5 = arith.constant 5.000000e-01 : f32
    %6 = vector.broadcast %cst_5 : f32 to vector<32x128xf32>
    %7 = arith.mulf %6, %5 : vector<32x128xf32>
    %8 = math.tanh %7 : vector<32x128xf32>
    %cst_6 = arith.constant 1.000000e+00 : f32
    %9 = vector.broadcast %cst_6 : f32 to vector<32x128xf32>
    %10 = arith.addf %8, %9 : vector<32x128xf32>
    %cst_7 = arith.constant 5.000000e-01 : f32
    %11 = vector.broadcast %cst_7 : f32 to vector<32x128xf32>
    %12 = arith.mulf %11, %10 : vector<32x128xf32>
    %c32 = arith.constant 32 : index
    %c0_8 = arith.constant 0 : index
    %13 = vector.load %arg2[%c32, %c0_8] : memref<208x64xf32, #tpu.memory_space<vmem>>, vector<24x32xf32>
    %c32_9 = arith.constant 32 : index
    %c0_10 = arith.constant 0 : index
    %14 = vector.load %arg3[%c32_9, %c0_10] : memref<208x1xf32, #tpu.memory_space<vmem>>, vector<24x1xf32>
    %cst_11 = arith.constant dense<0.000000e+00> : vector<24x128xf32>
    %15 = tpu.matmul %13, %12, %cst_11 {dimension_numbers = #tpu.dot_dimension_numbers<[1], [0], [0], [1], [0, 0, 1, 1], [], []>} : vector<24x32xf32>, vector<32x128xf32>, vector<24x128xf32> -> vector<24x128xf32>
    %16 = vector.broadcast %14 : vector<24x1xf32> to vector<24x128xf32>
    %17 = arith.addf %15, %16 : vector<24x128xf32>
    %cst_12 = arith.constant 5.000000e-01 : f32
    %18 = vector.broadcast %cst_12 : f32 to vector<24x128xf32>
    %19 = arith.mulf %18, %17 : vector<24x128xf32>
    %20 = math.tanh %19 : vector<24x128xf32>
    %cst_13 = arith.constant 1.000000e+00 : f32
    %21 = vector.broadcast %cst_13 : f32 to vector<24x128xf32>
    %22 = arith.addf %20, %21 : vector<24x128xf32>
    %cst_14 = arith.constant 5.000000e-01 : f32
    %23 = vector.broadcast %cst_14 : f32 to vector<24x128xf32>
    %24 = arith.mulf %23, %22 : vector<24x128xf32>
    %c56 = arith.constant 56 : index
    %c0_15 = arith.constant 0 : index
    %25 = vector.load %arg2[%c56, %c0_15] : memref<208x64xf32, #tpu.memory_space<vmem>>, vector<8x24xf32>
    %c56_16 = arith.constant 56 : index
    %c0_17 = arith.constant 0 : index
    %26 = vector.load %arg3[%c56_16, %c0_17] : memref<208x1xf32, #tpu.memory_space<vmem>>, vector<8x1xf32>
    %cst_18 = arith.constant dense<0.000000e+00> : vector<8x128xf32>
    %27 = tpu.matmul %25, %24, %cst_18 {dimension_numbers = #tpu.dot_dimension_numbers<[1], [0], [0], [1], [0, 0, 1, 1], [], []>} : vector<8x24xf32>, vector<24x128xf32>, vector<8x128xf32> -> vector<8x128xf32>
    %28 = vector.broadcast %26 : vector<8x1xf32> to vector<8x128xf32>
    %29 = arith.addf %27, %28 : vector<8x128xf32>
    %30 = math.tanh %29 : vector<8x128xf32>
    %c64 = arith.constant 64 : index
    %c0_19 = arith.constant 0 : index
    %31 = vector.load %arg2[%c64, %c0_19] : memref<208x64xf32, #tpu.memory_space<vmem>>, vector<48x8xf32>
    %c64_20 = arith.constant 64 : index
    %c0_21 = arith.constant 0 : index
    %32 = vector.load %arg3[%c64_20, %c0_21] : memref<208x1xf32, #tpu.memory_space<vmem>>, vector<48x1xf32>
    %cst_22 = arith.constant dense<0.000000e+00> : vector<48x128xf32>
    %33 = tpu.matmul %31, %30, %cst_22 {dimension_numbers = #tpu.dot_dimension_numbers<[1], [0], [0], [1], [0, 0, 1, 1], [], []>} : vector<48x8xf32>, vector<8x128xf32>, vector<48x128xf32> -> vector<48x128xf32>
    %34 = vector.broadcast %32 : vector<48x1xf32> to vector<48x128xf32>
    %35 = arith.addf %33, %34 : vector<48x128xf32>
    %cst_23 = arith.constant 5.000000e-01 : f32
    %36 = vector.broadcast %cst_23 : f32 to vector<48x128xf32>
    %37 = arith.mulf %36, %35 : vector<48x128xf32>
    %38 = math.tanh %37 : vector<48x128xf32>
    %cst_24 = arith.constant 1.000000e+00 : f32
    %39 = vector.broadcast %cst_24 : f32 to vector<48x128xf32>
    %40 = arith.addf %38, %39 : vector<48x128xf32>
    %cst_25 = arith.constant 5.000000e-01 : f32
    %41 = vector.broadcast %cst_25 : f32 to vector<48x128xf32>
    %42 = arith.mulf %41, %40 : vector<48x128xf32>
    %c112 = arith.constant 112 : index
    %c0_26 = arith.constant 0 : index
    %43 = vector.load %arg2[%c112, %c0_26] : memref<208x64xf32, #tpu.memory_space<vmem>>, vector<64x48xf32>
    %c112_27 = arith.constant 112 : index
    %c0_28 = arith.constant 0 : index
    %44 = vector.load %arg3[%c112_27, %c0_28] : memref<208x1xf32, #tpu.memory_space<vmem>>, vector<64x1xf32>
    %cst_29 = arith.constant dense<0.000000e+00> : vector<64x128xf32>
    %45 = tpu.matmul %43, %42, %cst_29 {dimension_numbers = #tpu.dot_dimension_numbers<[1], [0], [0], [1], [0, 0, 1, 1], [], []>} : vector<64x48xf32>, vector<48x128xf32>, vector<64x128xf32> -> vector<64x128xf32>
    %46 = vector.broadcast %44 : vector<64x1xf32> to vector<64x128xf32>
    %47 = arith.addf %45, %46 : vector<64x128xf32>
    %cst_30 = arith.constant 5.000000e-01 : f32
    %48 = vector.broadcast %cst_30 : f32 to vector<64x128xf32>
    %49 = arith.mulf %48, %47 : vector<64x128xf32>
    %50 = math.tanh %49 : vector<64x128xf32>
    %cst_31 = arith.constant 1.000000e+00 : f32
    %51 = vector.broadcast %cst_31 : f32 to vector<64x128xf32>
    %52 = arith.addf %50, %51 : vector<64x128xf32>
    %cst_32 = arith.constant 5.000000e-01 : f32
    %53 = vector.broadcast %cst_32 : f32 to vector<64x128xf32>
    %54 = arith.mulf %53, %52 : vector<64x128xf32>
    %c176 = arith.constant 176 : index
    %c0_33 = arith.constant 0 : index
    %55 = vector.load %arg2[%c176, %c0_33] : memref<208x64xf32, #tpu.memory_space<vmem>>, vector<32x64xf32>
    %c176_34 = arith.constant 176 : index
    %c0_35 = arith.constant 0 : index
    %56 = vector.load %arg3[%c176_34, %c0_35] : memref<208x1xf32, #tpu.memory_space<vmem>>, vector<32x1xf32>
    %cst_36 = arith.constant dense<0.000000e+00> : vector<32x128xf32>
    %57 = tpu.matmul %55, %54, %cst_36 {dimension_numbers = #tpu.dot_dimension_numbers<[1], [0], [0], [1], [0, 0, 1, 1], [], []>} : vector<32x64xf32>, vector<64x128xf32>, vector<32x128xf32> -> vector<32x128xf32>
    %58 = vector.broadcast %56 : vector<32x1xf32> to vector<32x128xf32>
    %59 = arith.addf %57, %58 : vector<32x128xf32>
    %c0_37 = arith.constant 0 : index
    %c0_38 = arith.constant 0 : index
    %60 = vector.load %arg4[%c0_37, %c0_38] : memref<32x128xf32, #tpu.memory_space<vmem>>, vector<32x128xf32>
    tpu.vector_store %arg4[%c0_37, %c0_38], %59 {strides = array<i32>} : memref<32x128xf32, #tpu.memory_space<vmem>>, vector<32x128xf32>,
    return
  }
  func.func @transform_0(%arg0: i32) -> (i32, i32) {
    %c0_i32 = arith.constant 0 : i32
    %c0_i32_0 = arith.constant 0 : i32
    return %c0_i32, %arg0 : i32, i32
  }
  func.func @transform_1(%arg0: i32) -> (i32, i32) {
    %c0_i32 = arith.constant 0 : i32
    %c0_i32_0 = arith.constant 0 : i32
    %c0_i32_1 = arith.constant 0 : i32
    return %c0_i32, %c0_i32_0 : i32, i32
  }
  func.func @transform_2(%arg0: i32) -> (i32, i32) {
    %c0_i32 = arith.constant 0 : i32
    %c0_i32_0 = arith.constant 0 : i32
    %c0_i32_1 = arith.constant 0 : i32
    return %c0_i32, %c0_i32_0 : i32, i32
  }
  func.func @transform_3(%arg0: i32) -> (i32, i32) {
    %c0_i32 = arith.constant 0 : i32
    %c0_i32_0 = arith.constant 0 : i32
    return %c0_i32, %arg0 : i32, i32
  }
}

</mosaic_0001>

<bundles_post_ra>
// kernel: autoencoder_forward.1
= control target key start
LH: loop header
LB: loop body
LE: loop exit
PB: predicated region body
PF: predicated region fallthrough
CT: control target
= control target key end

     0   :  { %v635_v0 = vmov 0   ;;  %vm44_vm0 = vcmask 130048   ;;  %vm123_vm1 = vcmask 261120   ;;  %vm178_vm2 = vcmask 195584   ;;  %s842_s2 = inlined_call_operand.vmem [shape: f32[208,1], index: 2, kind: input, shape index: {}]   ;;  %s843_s0 = inlined_call_operand.vmem [shape: f32[16,128], index: 0, kind: input, shape index: {}]   ;;  %s844_s1 = inlined_call_operand.vmem [shape: f32[208,64], index: 1, kind: input, shape index: {}]   ;;  %s845_s3 = inlined_call_operand.vmem [shape: f32[32,128], index: 3, kind: output, shape index: {}]  }
   0x1   :  { %589 = vset.pattern.permute.xlu1 %v635_v0  ;;  %588 = vset.pattern.permute.xlu0 %v635_v0  ;;  %v23_v1 = vld [vmem:[%s842_s2 + $0x18] sm:$0xff]  ;;  %v21_v2 = vld [vmem:[%s842_s2 + $0x8] sm:$0xff]  ;;  %v14_v4 = vld [vmem:[%s843_s0] sm:$0xff]  ;;  %vm245_vm3 = vcmask 64512   ;;  %vm379_vm4 = vcmask 392192   ;;  %vm505_vm5 = vcmask 523264  }
   0x2   :  { %v15_v3 = vld [vmem:[%s843_s0 + $0x8] sm:$0xff]  ;;  %41 = vperm.xlu0 %588, %v23_v1   ;;  %31 = vperm.xlu1 %589, %v21_v2   ;;  %v16_v5 = vld [vmem:[%s844_s1] sm:$0xff]  ;;  %v22_v6 = vld [vmem:[%s842_s2 + $0x10] sm:$0xff] }
   0x3   :  { %71 = vmatpush.msra.mxu0 %v15_v3  ;;  %590 = vset.pattern.permute.xlu2 %v635_v0  ;;  %v20_v7 = vld [vmem:[%s842_s2] sm:$0xff]  ;;  %v17_v8 = vld [vmem:[%s844_s1 + $0x8] sm:$0xff]  ;;  %v172_v10 = vld [vmem:[%s842_s2 + $0x38] sm:$0xff] }
   0x4   :  { %v105_v9 = vld [vmem:[%s842_s2 + $0x20] sm:$0xff]  ;;  %v18_v11 = vld [vmem:[%s844_s1 + $0x10] sm:$0xff]  ;;  %v212_v13 = vld [vmem:[%s842_s2 + $0x58] sm:$0xff] }
   0x5   :  { %72 = vmatpush.msra.mxu0 %v14_v4  ;;  %v213_v12 = vld [vmem:[%s842_s2 + $0x60] sm:$0xff]  ;;  %v19_v14 = vld [vmem:[%s844_s1 + $0x18] sm:$0xff]  ;;  %v210_v15 = vld [vmem:[%s842_s2 + $0x48] sm:$0xff] }
   0x6   :  { %555 = vmatmul.msk.f32.vlgmr.msra.gmra.mxu0 %vm44_vm0, %v16_v5  ;;  %v209_v16 = vld [vmem:[%s842_s2 + $0x40] sm:$0xff]  ;;  %v336_v18 = vld [vmem:[%s842_s2 + $0x98] sm:$0xff]  ;;  %v334_v19 = vld [vmem:[%s842_s2 + $0x88] sm:$0xff] }
   0x7   :  { %v337_v17 = vld [vmem:[%s842_s2 + $0xa0] sm:$0xff]  ;;  %v331_v21 = vld [vmem:[%s842_s2 + $0x70] sm:$0xff]  ;;  %v484_v24 = vld [vmem:[%s842_s2 + $0xc8] sm:$0xff] }
   0x8   :  { %v333_v20 = vld [vmem:[%s842_s2 + $0x80] sm:$0xff]  ;;  %v481_v22 = vld [vmem:[%s842_s2 + $0xb0] sm:$0xff]  ;;  %v106_v29 = vld [vmem:[%s842_s2 + $0x28] sm:$0xff] }
   0x9   :  { %v483_v23 = vld [vmem:[%s842_s2 + $0xc0] sm:$0xff]  ;;  %v107_v26 = vld [vmem:[%s842_s2 + $0x30] sm:$0xff]  ;;  %v214_v32 = vld [vmem:[%s842_s2 + $0x68] sm:$0xff] }
   0xa   :  { %36 = vperm.xlu0 %588, %v22_v6   ;;  %26 = vperm.xlu1 %589, %v20_v7   ;;  %v211_v41 = vld [vmem:[%s842_s2 + $0x50] sm:$0xff]  ;;  %v338_v45 = vld [vmem:[%s842_s2 + $0xa8] sm:$0xff]  ;;  %v102_v59 = vld [vmem:[%s844_s1 + $0x20] sm:$0xff] }
   0xb   :  { %120 = vperm.xlu2 %590, %v107_v26   ;;  %v335_v56 = vld [vmem:[%s842_s2 + $0x90] sm:$0xff]  ;;  %v332_v60 = vld [vmem:[%s842_s2 + $0x78] sm:$0xff]  ;;  %v103_v61 = vld [vmem:[%s844_s1 + $0x28] sm:$0xff] }
   0xc   :  { %v482_v62 = vld [vmem:[%s842_s2 + $0xb8] sm:$0xff]  ;;  %v104_v63 = vld [vmem:[%s844_s1 + $0x30] sm:$0xff] }
   0xe   :  { %556 = vmatmul.msk.f32.gmra.mxu0 %vm44_vm0, %v17_v8 }
  0x12   :  { %110 = vperm.xlu0 %588, %v105_v9   ;;  %175 = vperm.xlu1 %589, %v172_v10  }
  0x13   :  { %115 = vperm.xlu2 %590, %v106_v29   ;;  %v206_v29 = vld [vmem:[%s844_s1 + $0x58] sm:$0xff] }
  0x16   :  { %557 = vmatmul.msk.f32.gmra.mxu0 %vm44_vm0, %v18_v11 }
  0x1a   :  { %237 = vperm.xlu0 %588, %v213_v12   ;;  %232 = vperm.xlu1 %589, %v212_v13  }
  0x1b   :  { %242 = vperm.xlu2 %590, %v214_v32  }
  0x1e   :  { %558 = vmatmul.msk.f32.gmra.mxu0 %vm44_vm0, %v19_v14 }
  0x22   :  { %222 = vperm.xlu0 %588, %v210_v15   ;;  %217 = vperm.xlu1 %589, %v209_v16  }
  0x23   :  { %227 = vperm.xlu2 %590, %v211_v41  }
  0x2a   :  { %371 = vperm.xlu0 %588, %v337_v17   ;;  %366 = vperm.xlu1 %589, %v336_v18  }
  0x2b   :  { %376 = vperm.xlu2 %590, %v338_v45  }
  0x32   :  { %356 = vperm.xlu0 %588, %v334_v19   ;;  %351 = vperm.xlu1 %589, %v333_v20  }
  0x33   :  { %361 = vperm.xlu2 %590, %v335_v56  }
  0x3a   :  { %341 = vperm.xlu0 %588, %v331_v21   ;;  %487 = vperm.xlu1 %589, %v481_v22   ;;  %v171_v21 = vld [vmem:[%s844_s1 + $0x38] sm:$0xff] }
  0x3b   :  { %346 = vperm.xlu2 %590, %v332_v60  }
  0x42   :  { %497 = vperm.xlu0 %588, %v483_v23   ;;  %502 = vperm.xlu1 %589, %v484_v24  }
  0x43   :  { %492 = vperm.xlu2 %590, %v482_v62  }
  0x65   :  { %v121_v0 = vpop.permute.xlu2 %120 }
  0x6d   :  { %v116_v3 = vpop.permute.xlu2 %115 }
  0x74   :  { %v42_v27 = vpop.permute.xlu0 %41  ;;  %v32_v30 = vpop.permute.xlu1 %31 }
  0x7c   :  { %v37_v33 = vpop.permute.xlu0 %36  ;;  %v27_v36 = vpop.permute.xlu1 %26 }
  0x83   :  { %v74_v25 = vpop.f32.mrf.mxu0 }
  0x84   :  { %v75_v37 = vadd.f32 %v74_v25, %v27_v36  ;;  %v111_v4 = vpop.permute.xlu0 %110  ;;  %v176_v22 = vpop.permute.xlu1 %175  ;;  %v203_v25 = vld [vmem:[%s844_s1 + $0x40] sm:$0xff] }
  0x85   :  { %v243_v36 = vpop.permute.xlu2 %242 }
  0x86   :  { %v86_v43 = vmul.f32 0.5, %v75_v37 }
  0x8b   :  { %v77_v28 = vpop.f32.mrf.mxu0 }
  0x8c   :  { %v78_v35 = vadd.f32 %v77_v28, %v32_v30  ;;  %v205_v28 = vld [vmem:[%s844_s1 + $0x50] sm:$0xff]  ;;  %v207_v30 = vld [vmem:[%s844_s1 + $0x60] sm:$0xff]  ;;  %v238_v37 = vpop.permute.xlu0 %237 }
  0x8e   :  { %v87_v39 = vmul.f32 0.5, %v78_v35 }
  0x93   :  { %v80_v31 = vpop.f32.mrf.mxu0 }
  0x94   :  { %v81_v34 = vadd.f32 %v80_v31, %v37_v33  ;;  %v208_v31 = vld [vmem:[%s844_s1 + $0x68] sm:$0xff]  ;;  %v223_v45 = vpop.permute.xlu0 %222 }
  0x96   :  { %v88_v38 = vmul.f32 0.5, %v81_v34 }
  0x98   :  { %591 = vtanh.f32 %v88_v38  ;;  %v233_v38 = vpop.permute.xlu1 %232 }
  0x99   :  { %593 = vtanh.f32 %v87_v39 }
  0x9b   :  { %v83_v40 = vpop.f32.mrf.mxu0 }
  0x9c   :  { %v84_v42 = vadd.f32 %v83_v40, %v42_v27  ;;  %v204_v27 = vld [vmem:[%s844_s1 + $0x48] sm:$0xff] }
  0x9e   :  { %v89_v44 = vmul.f32 0.5, %v84_v42  ;;  %v592_v46 = vpop.eup %591  ;;  %v228_v42 = vpop.permute.xlu2 %227 }
  0x9f   :  { %v594_v47 = vpop.eup %593  ;;  %v96_v50 = vadd.f32 1.0, %v592_v46 }
  0xa0   :  { %595 = vtanh.f32 %v89_v44  ;;  %v95_v53 = vadd.f32 1.0, %v594_v47 }
  0xa1   :  { %597 = vtanh.f32 %v86_v43  ;;  %v100_v54 = vmul.f32 0.5, %v96_v50  ;;  %v218_v50 = vpop.permute.xlu1 %217 }
  0xa2   :  { %v99_v57 = vmul.f32 0.5, %v95_v53 }
  0xa6   :  { %v596_v48 = vpop.eup %595 }
  0xa7   :  { %v97_v49 = vadd.f32 1.0, %v596_v48  ;;  %v598_v51 = vpop.eup %597 }
  0xa8   :  { %v94_v55 = vadd.f32 1.0, %v598_v51 }
  0xa9   :  { %v101_v52 = vmul.f32 0.5, %v97_v49 }
  0xaa   :  { %v98_v58 = vmul.f32 0.5, %v94_v55 }
  0xab   :  { %145 = vmatpush.msra.mxu1 %v101_v52 }
  0xad   :  { %146 = vmatpush.msra.mxu1 %v100_v54 }
  0xaf   :  { %147 = vmatpush.msra.mxu1 %v99_v57 }
  0xb1   :  { %148 = vmatpush.msra.mxu1 %v98_v58 }
  0xb2   :  { %559 = vmatmul.msk.f32.vlgmr.msra.gmra.mxu1 %vm123_vm1, %v102_v59 }
  0xba   :  { %560 = vmatmul.msk.f32.gmra.mxu1 %vm123_vm1, %v103_v61 }
  0xc2   :  { %561 = vmatmul.msk.f32.gmra.mxu1 %vm123_vm1, %v104_v63 }
 0x12f   :  { %v150_v1 = vpop.f32.mrf.mxu1 }
 0x130   :  { %v151_v6 = vadd.f32 %v150_v1, %v111_v4 }
 0x132   :  { %v159_v8 = vmul.f32 0.5, %v151_v6 }
 0x137   :  { %v153_v2 = vpop.f32.mrf.mxu1 }
 0x138   :  { %v154_v5 = vadd.f32 %v153_v2, %v116_v3 }
 0x13a   :  { %v160_v7 = vmul.f32 0.5, %v154_v5 }
 0x13c   :  { %599 = vtanh.f32 %v160_v7 }
 0x13d   :  { %601 = vtanh.f32 %v159_v8 }
 0x13f   :  { %v156_v9 = vpop.f32.mrf.mxu1 }
 0x140   :  { %v157_v10 = vadd.f32 %v156_v9, %v121_v0 }
 0x142   :  { %v161_v11 = vmul.f32 0.5, %v157_v10  ;;  %v600_v12 = vpop.eup %599  ;;  %v323_v10 = vld [vmem:[%s844_s1 + $0x70] sm:$0xff] }
 0x143   :  { %v602_v13 = vpop.eup %601  ;;  %v166_v16 = vadd.f32 1.0, %v600_v12  ;;  %v324_v12 = vld [vmem:[%s844_s1 + $0x78] sm:$0xff] }
 0x144   :  { %603 = vtanh.f32 %v161_v11  ;;  %v165_v18 = vadd.f32 1.0, %v602_v13  ;;  %v326_v11 = vld [vmem:[%s844_s1 + $0x88] sm:$0xff]  ;;  %v327_v13 = vld [vmem:[%s844_s1 + $0x90] sm:$0xff] }
 0x145   :  { %v169_v19 = vmul.f32 0.5, %v166_v16  ;;  %v329_v16 = vld [vmem:[%s844_s1 + $0xa0] sm:$0xff] }
 0x146   :  { %v168_v20 = vmul.f32 0.5, %v165_v18 }
 0x14a   :  { %v604_v14 = vpop.eup %603 }
 0x14b   :  { %v167_v15 = vadd.f32 1.0, %v604_v14  ;;  %v325_v14 = vld [vmem:[%s844_s1 + $0x80] sm:$0xff] }
 0x14d   :  { %v170_v17 = vmul.f32 0.5, %v167_v15  ;;  %v328_v15 = vld [vmem:[%s844_s1 + $0x98] sm:$0xff] }
 0x14f   :  { %195 = vmatpush.msra.mxu2 %v170_v17  ;;  %v330_v17 = vld [vmem:[%s844_s1 + $0xa8] sm:$0xff] }
 0x151   :  { %196 = vmatpush.msra.mxu2 %v169_v19 }
 0x153   :  { %197 = vmatpush.msra.mxu2 %v168_v20 }
 0x154   :  { %562 = vmatmul.msk.f32.vlgmr.msra.gmra.mxu2 %vm178_vm2, %v171_v21  ;;  %v377_v21 = vpop.permute.xlu2 %376 }
 0x1d7   :  { %v199_v23 = vpop.f32.mrf.mxu2 }
 0x1d8   :  { %v200_v24 = vadd.f32 %v199_v23, %v176_v22  ;;  %v372_v23 = vpop.permute.xlu0 %371 }
 0x1da   :  { %605 = vtanh.f32 %v200_v24 }
 0x1e0   :  { %v606_v26 = vpop.eup %605 }
 0x1e1   :  { %279 = vmatpush.msra.mxu3 %v606_v26 }
 0x1e2   :  { %563 = vmatmul.msk.f32.vlgmr.msra.gmra.mxu3 %vm245_vm3, %v203_v25  ;;  %v367_v25 = vpop.permute.xlu1 %366 }
 0x1ea   :  { %564 = vmatmul.msk.f32.gmra.mxu3 %vm245_vm3, %v204_v27  ;;  %v362_v27 = vpop.permute.xlu2 %361 }
 0x1f2   :  { %565 = vmatmul.msk.f32.gmra.mxu3 %vm245_vm3, %v205_v28 }
 0x1fa   :  { %566 = vmatmul.msk.f32.gmra.mxu3 %vm245_vm3, %v206_v29  ;;  %v357_v29 = vpop.permute.xlu0 %356 }
 0x202   :  { %567 = vmatmul.msk.f32.gmra.mxu3 %vm245_vm3, %v207_v30 }
 0x20a   :  { %568 = vmatmul.msk.f32.gmra.mxu3 %vm245_vm3, %v208_v31 }
 0x265   :  { %v281_v32 = vpop.f32.mrf.mxu3 }
 0x266   :  { %v282_v51 = vadd.f32 %v281_v32, %v218_v50 }
 0x268   :  { %v299_v55 = vmul.f32 0.5, %v282_v51 }
 0x26d   :  { %v284_v33 = vpop.f32.mrf.mxu3 }
 0x26e   :  { %v285_v48 = vadd.f32 %v284_v33, %v223_v45  ;;  %v342_v45 = vpop.permute.xlu0 %341 }
 0x270   :  { %v300_v54 = vmul.f32 0.5, %v285_v48 }
 0x275   :  { %v287_v34 = vpop.f32.mrf.mxu3 }
 0x276   :  { %v288_v43 = vadd.f32 %v287_v34, %v228_v42  ;;  %v347_v42 = vpop.permute.xlu2 %346 }
 0x278   :  { %v301_v52 = vmul.f32 0.5, %v288_v43 }
 0x27d   :  { %v290_v35 = vpop.f32.mrf.mxu3 }
 0x27e   :  { %v291_v41 = vadd.f32 %v290_v35, %v233_v38  ;;  %v352_v38 = vpop.permute.xlu1 %351 }
 0x280   :  { %v302_v46 = vmul.f32 0.5, %v291_v41 }
 0x285   :  { %v293_v39 = vpop.f32.mrf.mxu3 }
 0x286   :  { %v294_v40 = vadd.f32 %v293_v39, %v238_v37 }
 0x288   :  { %v303_v44 = vmul.f32 0.5, %v294_v40 }
 0x28a   :  { %607 = vtanh.f32 %v303_v44 }
 0x28b   :  { %609 = vtanh.f32 %v302_v46 }
 0x28d   :  { %v296_v47 = vpop.f32.mrf.mxu3 }
 0x28e   :  { %v297_v49 = vadd.f32 %v296_v47, %v243_v36 }
 0x290   :  { %v304_v53 = vmul.f32 0.5, %v297_v49  ;;  %v608_v56 = vpop.eup %607 }
 0x291   :  { %v610_v57 = vpop.eup %609  ;;  %v315_v60 = vadd.f32 1.0, %v608_v56 }
 0x292   :  { %611 = vtanh.f32 %v304_v53  ;;  %v314_v63 = vadd.f32 1.0, %v610_v57 }
 0x293   :  { %613 = vtanh.f32 %v301_v52  ;;  %v321_v1 = vmul.f32 0.5, %v315_v60 }
 0x294   :  { %615 = vtanh.f32 %v300_v54  ;;  %v320_v4 = vmul.f32 0.5, %v314_v63 }
 0x295   :  { %617 = vtanh.f32 %v299_v55 }
 0x298   :  { %v612_v58 = vpop.eup %611 }
 0x299   :  { %v316_v59 = vadd.f32 1.0, %v612_v58  ;;  %v614_v61 = vpop.eup %613 }
 0x29a   :  { %v616_v0 = vpop.eup %615  ;;  %v313_v2 = vadd.f32 1.0, %v614_v61 }
 0x29b   :  { %v322_v62 = vmul.f32 0.5, %v316_v59  ;;  %v618_v3 = vpop.eup %617  ;;  %v312_v5 = vadd.f32 1.0, %v616_v0 }
 0x29c   :  { %v319_v6 = vmul.f32 0.5, %v313_v2  ;;  %v311_v7 = vadd.f32 1.0, %v618_v3 }
 0x29d   :  { %414 = vmatpush.msrb.mxu0 %v322_v62  ;;  %581 = vmatpush.msrb.mxu2 %v322_v62  ;;  %v318_v8 = vmul.f32 0.5, %v312_v5 }
 0x29e   :  { %v317_v9 = vmul.f32 0.5, %v311_v7 }
 0x29f   :  { %415 = vmatpush.msrb.mxu0 %v321_v1  ;;  %582 = vmatpush.msrb.mxu2 %v321_v1 }
 0x2a1   :  { %416 = vmatpush.msrb.mxu0 %v320_v4  ;;  %583 = vmatpush.msrb.mxu2 %v320_v4 }
 0x2a3   :  { %417 = vmatpush.msrb.mxu0 %v319_v6  ;;  %584 = vmatpush.msrb.mxu2 %v319_v6 }
 0x2a5   :  { %418 = vmatpush.msrb.mxu0 %v318_v8  ;;  %585 = vmatpush.msrb.mxu2 %v318_v8 }
 0x2a7   :  { %419 = vmatpush.msrb.mxu0 %v317_v9  ;;  %586 = vmatpush.msrb.mxu2 %v317_v9 }
 0x2a8   :  { %569 = vmatmul.msk.f32.vlgmr.msrb.gmra.mxu0 %vm379_vm4, %v323_v10  ;;  %572 = vmatmul.msk.f32.vlgmr.msrb.gmra.mxu2 %vm379_vm4, %v326_v11  ;;  %v477_v10 = vld [vmem:[%s844_s1 + $0xb0] sm:$0xff]  ;;  %v478_v11 = vld [vmem:[%s844_s1 + $0xb8] sm:$0xff] }
 0x2b0   :  { %570 = vmatmul.msk.f32.gmra.mxu0 %vm379_vm4, %v324_v12  ;;  %573 = vmatmul.msk.f32.gmra.mxu2 %vm379_vm4, %v327_v13  ;;  %v479_v12 = vld [vmem:[%s844_s1 + $0xc0] sm:$0xff]  ;;  %v480_v13 = vld [vmem:[%s844_s1 + $0xc8] sm:$0xff] }
 0x2b8   :  { %571 = vmatmul.msk.f32.gmra.mxu0 %vm379_vm4, %v325_v14  ;;  %574 = vmatmul.msk.f32.gmra.mxu2 %vm379_vm4, %v328_v15  ;;  %v488_v14 = vpop.permute.xlu1 %487 }
 0x2c0   :  { %575 = vmatmul.msk.f32.gmra.mxu2 %vm379_vm4, %v329_v16 }
 0x2c8   :  { %576 = vmatmul.msk.f32.gmra.mxu2 %vm379_vm4, %v330_v17  ;;  %v493_v17 = vpop.permute.xlu2 %492 }
 0x325   :  { %v421_v20 = vpop.f32.mrf.mxu0 }
 0x326   :  { %v422_v46 = vadd.f32 %v421_v20, %v342_v45  ;;  %v498_v20 = vpop.permute.xlu0 %497 }
 0x328   :  { %v445_v52 = vmul.f32 0.5, %v422_v46 }
 0x32b   :  { %v430_v18 = vpop.f32.mrf.mxu2 }
 0x32c   :  { %v431_v36 = vadd.f32 %v430_v18, %v357_v29 }
 0x32d   :  { %v424_v24 = vpop.f32.mrf.mxu0 }
 0x32e   :  { %v448_v43 = vmul.f32 0.5, %v431_v36  ;;  %v425_v44 = vadd.f32 %v424_v24, %v347_v42 }
 0x330   :  { %v446_v49 = vmul.f32 0.5, %v425_v44 }
 0x333   :  { %v433_v19 = vpop.f32.mrf.mxu2 }
 0x334   :  { %v434_v31 = vadd.f32 %v433_v19, %v362_v27 }
 0x335   :  { %v427_v33 = vpop.f32.mrf.mxu0 }
 0x336   :  { %v449_v39 = vmul.f32 0.5, %v434_v31  ;;  %v428_v40 = vadd.f32 %v427_v33, %v352_v38 }
 0x338   :  { %v447_v47 = vmul.f32 0.5, %v428_v40 }
 0x33b   :  { %v436_v22 = vpop.f32.mrf.mxu2 }
 0x33c   :  { %v437_v30 = vadd.f32 %v436_v22, %v367_v25 }
 0x33e   :  { %v450_v34 = vmul.f32 0.5, %v437_v30 }
 0x343   :  { %v439_v26 = vpop.f32.mrf.mxu2 }
 0x344   :  { %v440_v28 = vadd.f32 %v439_v26, %v372_v23  ;;  %v503_v23 = vpop.permute.xlu1 %502 }
 0x346   :  { %v451_v32 = vmul.f32 0.5, %v440_v28 }
 0x348   :  { %619 = vtanh.f32 %v451_v32 }
 0x349   :  { %621 = vtanh.f32 %v450_v34 }
 0x34b   :  { %v442_v35 = vpop.f32.mrf.mxu2 }
 0x34c   :  { %v443_v37 = vadd.f32 %v442_v35, %v377_v21 }
 0x34e   :  { %v452_v41 = vmul.f32 0.5, %v443_v37  ;;  %v620_v48 = vpop.eup %619 }
 0x34f   :  { %v622_v50 = vpop.eup %621  ;;  %v467_v54 = vadd.f32 1.0, %v620_v48 }
 0x350   :  { %623 = vtanh.f32 %v452_v41  ;;  %v466_v57 = vadd.f32 1.0, %v622_v50 }
 0x351   :  { %625 = vtanh.f32 %v449_v39  ;;  %v475_v59 = vmul.f32 0.5, %v467_v54 }
 0x352   :  { %627 = vtanh.f32 %v448_v43  ;;  %v474_v62 = vmul.f32 0.5, %v466_v57 }
 0x353   :  { %629 = vtanh.f32 %v447_v47 }
 0x354   :  { %631 = vtanh.f32 %v446_v49 }
 0x355   :  { %633 = vtanh.f32 %v445_v52 }
 0x356   :  { %v624_v51 = vpop.eup %623 }
 0x357   :  { %v468_v53 = vadd.f32 1.0, %v624_v51  ;;  %v626_v55 = vpop.eup %625 }
 0x358   :  { %v628_v58 = vpop.eup %627  ;;  %v465_v60 = vadd.f32 1.0, %v626_v55 }
 0x359   :  { %v476_v56 = vmul.f32 0.5, %v468_v53  ;;  %v630_v61 = vpop.eup %629  ;;  %v464_v63 = vadd.f32 1.0, %v628_v58 }
 0x35a   :  { %v632_v0 = vpop.eup %631  ;;  %v473_v1 = vmul.f32 0.5, %v465_v60  ;;  %v463_v2 = vadd.f32 1.0, %v630_v61 }
 0x35b   :  { %526 = vmatpush.msrb.mxu1 %v476_v56  ;;  %v634_v3 = vpop.eup %633  ;;  %v472_v4 = vmul.f32 0.5, %v464_v63  ;;  %v462_v5 = vadd.f32 1.0, %v632_v0 }
 0x35c   :  { %v471_v6 = vmul.f32 0.5, %v463_v2  ;;  %v461_v7 = vadd.f32 1.0, %v634_v3 }
 0x35d   :  { %527 = vmatpush.msrb.mxu1 %v475_v59  ;;  %v470_v8 = vmul.f32 0.5, %v462_v5 }
 0x35e   :  { %v469_v9 = vmul.f32 0.5, %v461_v7 }
 0x35f   :  { %528 = vmatpush.msrb.mxu1 %v474_v62 }
 0x361   :  { %529 = vmatpush.msrb.mxu1 %v473_v1 }
 0x363   :  { %530 = vmatpush.msrb.mxu1 %v472_v4 }
 0x365   :  { %531 = vmatpush.msrb.mxu1 %v471_v6 }
 0x367   :  { %532 = vmatpush.msrb.mxu1 %v470_v8 }
 0x369   :  { %533 = vmatpush.msrb.mxu1 %v469_v9 }
 0x36a   :  { %577 = vmatmul.msk.f32.vlgmr.msrb.gmra.mxu1 %vm505_vm5, %v477_v10 }
 0x372   :  { %578 = vmatmul.msk.f32.gmra.mxu1 %vm505_vm5, %v478_v11 }
 0x37a   :  { %579 = vmatmul.msk.f32.gmra.mxu1 %vm505_vm5, %v479_v12 }
 0x382   :  { %580 = vmatmul.msk.f32.gmra.mxu1 %vm505_vm5, %v480_v13 }
 0x3e7   :  { %v535_v15 = vpop.f32.mrf.mxu1 }
 0x3e8   :  { %v536_v16 = vadd.f32 %v535_v15, %v488_v14 }
 0x3ea   :  { %547 = vst [vmem:[%s845_s3] sm:$0xff] %v536_v16 }
 0x3ef   :  { %v538_v18 = vpop.f32.mrf.mxu1 }
 0x3f0   :  { %v539_v19 = vadd.f32 %v538_v18, %v493_v17 }
 0x3f2   :  { %548 = vst [vmem:[%s845_s3 + $0x8] sm:$0xff] %v539_v19 }
 0x3f7   :  { %v541_v21 = vpop.f32.mrf.mxu1 }
 0x3f8   :  { %v542_v22 = vadd.f32 %v541_v21, %v498_v20 }
 0x3fa   :  { %549 = vst [vmem:[%s845_s3 + $0x10] sm:$0xff] %v542_v22 }
 0x3ff   :  { %v544_v24 = vpop.f32.mrf.mxu1 }
 0x400   :  { %v545_v25 = vadd.f32 %v544_v24, %v503_v23 }
 0x402   :  { %550 = vst [vmem:[%s845_s3 + $0x18] sm:$0xff] %v545_v25 }

</bundles_post_ra>
